<compile_context>
chip_gen: v7x
topology: tpu7x:2x2x1
jax: 0.10.0
libtpu: 0.0.40
codegen_flags: <defaults>
</compile_context>

<pallas_src>
import functools

import jax
import jax.numpy as jnp
import numpy as np
from jax.experimental import pallas as pl
from jax.experimental.pallas import tpu as pltpu

_MiB = 1024 * 1024


# --------------------------------------------------------------------------- #
# Kernels
# --------------------------------------------------------------------------- #
def _batch_tiled_kernel(x_ref, gamma_ref, o_ref, *, eps):
    """One step owns a full (tile_b, S, C) block: both reductions in-register."""
    x = x_ref[...].astype(jnp.float32)                       # (TB, S, C)

    # LayerNorm stats over the channel (last) dim; biased variance like PyTorch.
    mean_c = jnp.mean(x, axis=-1, keepdims=True)
    xc = x - mean_c
    var_c = jnp.mean(xc * xc, axis=-1, keepdims=True)
    y = xc * jax.lax.rsqrt(var_c + jnp.float32(eps))          # normalized, no affine

    # beta cancels (constant over S); apply gamma once at the very end.
    seq_mean = jnp.mean(y, axis=1, keepdims=True)             # (TB, 1, C)
    gamma = gamma_ref[...].astype(jnp.float32)                 # (1, C) -> broadcasts
    o_ref[...] = ((y - seq_mean) * gamma).astype(o_ref.dtype)


def _seq_tiled_kernel(x_ref, gamma_ref, o_ref, acc_ref, *, eps, grid_s, seq_len):
    """Two-phase sweep over S: phase 0 accumulates sum_S(y), phase 1 writes out."""
    j = pl.program_id(1)

    x = x_ref[...].astype(jnp.float32)                        # (1, TS, C)
    mean_c = jnp.mean(x, axis=-1, keepdims=True)
    xc = x - mean_c
    var_c = jnp.mean(xc * xc, axis=-1, keepdims=True)
    y = xc * jax.lax.rsqrt(var_c + jnp.float32(eps))

    @pl.when(j == 0)                                           # new batch block
    def _():
        acc_ref[...] = jnp.zeros_like(acc_ref)

    @pl.when(j < grid_s)                                       # phase 0: accumulate
    def _():
        acc_ref[...] += jnp.sum(y, axis=1, keepdims=True)

    @pl.when(j >= grid_s)                                      # phase 1: finalize
    def _():
        seq_mean = acc_ref[...] * jnp.float32(1.0 / seq_len)   # (1, 1, C)
        gamma = gamma_ref[...].astype(jnp.float32)              # (1, C)
        o_ref[...] = ((y - seq_mean) * gamma).astype(o_ref.dtype)


# --------------------------------------------------------------------------- #
# Tiling heuristics
# --------------------------------------------------------------------------- #
def _choose_tile_b(B, S, C, budget_bytes, min_steps=8):
    """Largest batch tile that fits the f32 block budget while keeping enough
    grid steps for the auto-pipeline to overlap DMA, preferring an even number
    of steps so both v7x TensorCores stay busy."""
    block_f32 = lambda tb: tb * S * C * 4
    candidates = [d for d in range(1, B + 1) if B % d == 0]
    fits = [tb for tb in candidates if block_f32(tb) <= budget_bytes] or [1]
    target = min(min_steps, B)

    def score(tb):
        steps = B // tb
        return (steps >= target,                  # enough steps to pipeline
                steps % 2 == 0 or steps == 1,     # even -> megacore balanced
                block_f32(tb))                    # then: biggest block
    return max(fits, key=score)


def _choose_tile_s(S, C, budget_bytes):
    """Largest proper S-tile that is a multiple of 8 (layout constraint), divides
    S exactly (exact seq-mean), and fits the f32 block budget."""
    best = None
    for ts in range(8, S, 8):
        if S % ts == 0 and ts * C * 4 <= budget_bytes:
            best = ts
    return best


def _vmem_limit_bytes(block_elems, itemsize):
    # double-buffered in + out blocks, ~4 live full-tile f32 temporaries, slack;
    # then doubled for safety and clamped to stay comfortable on all chips
    # (v5e scoped default 16 MiB, v7x physical 64 MiB).
    need = 4 * block_elems * itemsize + 4 * block_elems * 4 + 1 * _MiB
    return int(min(max(2 * need, 32 * _MiB), 48 * _MiB))


# --------------------------------------------------------------------------- #
# Public wrapper
# --------------------------------------------------------------------------- #
def my_layernorm(x, gamma, beta=None, *, eps=1e-5, tile_b=None, tile_s=None,
                 block_budget_bytes=2 * _MiB):
    """my_Layernorm forward.  x: (B, S, C); gamma/beta: (C,) -> (B, S, C).

    `beta` is accepted for API parity with nn.LayerNorm but cancels exactly in
    `x_hat - mean_S(x_hat)`, so it never reaches the kernel.
    """
    del beta  # mathematically cancelled by the seq-mean subtraction
    B, S, C = x.shape
    gamma2 = gamma.reshape(1, C)
    itemsize = x.dtype.itemsize

    # NOTE: C is the lane dim.  If C < 128 (as in this demo) every load/store
    # runs at C/128 lane utilization; packing 128//C sequence rows per lane row
    # (or padding C) would be the next lever for such deployments.  Typical
    # d_model deployments have C >= 128, so this is left as-is here.

    # ---- path selection ---------------------------------------------------- #
    use_seq = tile_s is not None
    if not use_seq and tile_b is None and S * C * 4 > block_budget_bytes:
        auto_ts = _choose_tile_s(S, C, block_budget_bytes)
        if auto_ts is not None:
            use_seq, tile_s = True, auto_ts
        # else: fall through to one big block per batch row, best effort with a
        # raised vmem limit (e.g. S not divisible by 8).

    if use_seq:
        assert S % tile_s == 0 and (tile_s % 8 == 0 or tile_s == S), (S, tile_s)
        grid_s = S // tile_s
        grid = (B, 2 * grid_s)
        cost = pl.CostEstimate(
            flops=int(16 * B * S * C),
            transcendentals=int(2 * B * S),
            bytes_accessed=int(3 * B * S * C * itemsize))  # x read twice, out once
        kernel = functools.partial(_seq_tiled_kernel, eps=eps, grid_s=grid_s,
                                   seq_len=S)
        return pl.pallas_call(
            kernel,
            out_shape=jax.ShapeDtypeStruct((B, S, C), x.dtype),
            grid=grid,
            in_specs=[
                pl.BlockSpec(
                    (1, tile_s, C),
                    lambda b, j: (b, jnp.where(j < grid_s, j, j - grid_s), 0)),
                pl.BlockSpec((1, C), lambda b, j: (0, 0)),
            ],
            # Phase 0 parks the output index on block 0 (no extra writebacks);
            # phase 1 walks the S blocks and writes the real values.
            out_specs=pl.BlockSpec(
                (1, tile_s, C),
                lambda b, j: (b, jnp.where(j < grid_s, 0, j - grid_s), 0)),
            scratch_shapes=[pltpu.VMEM((1, 1, C), jnp.float32)],
            compiler_params=pltpu.CompilerParams(
                dimension_semantics=("parallel", "arbitrary"),
                vmem_limit_bytes=_vmem_limit_bytes(tile_s * C, itemsize)),
            cost_estimate=cost,
        )(x, gamma2)

    # ---- default: batch-tiled path ------------------------------------------ #
    if tile_b is None:
        tile_b = _choose_tile_b(B, S, C, block_budget_bytes)
    assert B % tile_b == 0, (B, tile_b)
    cost = pl.CostEstimate(
        flops=int(10 * B * S * C),
        transcendentals=int(B * S),
        bytes_accessed=int(2 * B * S * C * itemsize))
    kernel = functools.partial(_batch_tiled_kernel, eps=eps)
    return pl.pallas_call(
        kernel,
        out_shape=jax.ShapeDtypeStruct((B, S, C), x.dtype),
        grid=(B // tile_b,),
        in_specs=[
            pl.BlockSpec((tile_b, S, C), lambda b: (b, 0, 0)),
            pl.BlockSpec((1, C), lambda b: (0, 0)),
        ],
        out_specs=pl.BlockSpec((tile_b, S, C), lambda b: (b, 0, 0)),
        compiler_params=pltpu.CompilerParams(
            dimension_semantics=("parallel",),
            vmem_limit_bytes=_vmem_limit_bytes(tile_b * S * C, itemsize)),
        cost_estimate=cost,
    )(x, gamma2)


# --------------------------------------------------------------------------- #
# Reference + self-test
# --------------------------------------------------------------------------- #
def _reference(x, gamma, beta, eps=1e-5):
    """Pure-numpy replica of my_Layernorm.forward (PyTorch semantics)."""
    x = x.astype(np.float32)
    mean = x.mean(axis=-1, keepdims=True)
    var = ((x - mean) ** 2).mean(axis=-1, keepdims=True)   # biased, like nn.LayerNorm
    x_hat = (x - mean) / np.sqrt(var + eps) * gamma + beta
    bias = x_hat.mean(axis=1, keepdims=True)
    return x_hat - bias


if __name__ == "__main__":
    key = jax.random.PRNGKey(0)
    kx, kg, kb, kx2 = jax.random.split(key, 4)

    # Non-trivial affine params to exercise full LayerNorm semantics.
    C = 32
    gamma = 1.0 + 0.1 * jax.random.normal(kg, (C,), dtype=jnp.float32)
    beta = 0.1 * jax.random.normal(kb, (C,), dtype=jnp.float32)

    # 1) Default batch-tiled path: batch=2, seq=8, channels=32.
    B, S = 2, 8
    x = jax.random.normal(kx, (B, S, C), dtype=jnp.float32)
    out = jax.block_until_ready(my_layernorm(x, gamma, beta))
    ref = _reference(np.asarray(x), np.asarray(gamma), np.asarray(beta))
    assert out.shape == (B, S, C), out.shape
    np.testing.assert_allclose(np.asarray(out), ref, rtol=1e-5, atol=1e-5)

    # 2) Seq-tiled fallback (used automatically for long sequences / v7x VMEM):
    #    force it at a small shape to validate the two-phase accumulator logic.
    B2, S2 = 2, 16
    x2 = jax.random.normal(kx2, (B2, S2, C), dtype=jnp.float32)
    out2 = jax.block_until_ready(my_layernorm(x2, gamma, beta, tile_s=8))
    ref2 = _reference(np.asarray(x2), np.asarray(gamma), np.asarray(beta))
    np.testing.assert_allclose(np.asarray(out2), ref2, rtol=1e-5, atol=1e-5)

    print("KERNEL_OK")
</pallas_src>

<mosaic_0001>
module attributes {stable_mosaic.version = 11 : i64} {
  func.func @_batch_tiled_kernel(%arg0: i32, %arg1: memref<1x8x32xf32, #tpu.memory_space<vmem>>, %arg2: memref<1x32xf32, #tpu.memory_space<vmem>>, %arg3: memref<1x8x32xf32, #tpu.memory_space<vmem>>) attributes {dimension_semantics = [#tpu.dimension_semantics<parallel>], iteration_bounds = array<i64: 2>, scalar_prefetch = 0 : i64, scratch_operands = 0 : i64, tpu.core_type = #tpu.core_type<tc>, window_params = [{transform_indices = @transform_0, window_bounds = array<i64: 1, 8, 32>}, {pipeline_mode = #tpu.pipeline_mode<synchronous>, transform_indices = @transform_1, window_bounds = array<i64: 1, 32>}, {transform_indices = @transform_2, window_bounds = array<i64: 1, 8, 32>}]} {
    %c0 = arith.constant 0 : index
    %c0_0 = arith.constant 0 : index
    %c0_1 = arith.constant 0 : index
    %0 = vector.load %arg1[%c0, %c0_0, %c0_1] : memref<1x8x32xf32, #tpu.memory_space<vmem>>, vector<1x8x32xf32>
    %cst = arith.constant dense<0.000000e+00> : vector<1x8xf32>
    %1 = vector.multi_reduction <add>, %0, %cst [2] : vector<1x8x32xf32> to vector<1x8xf32>
    %2 = vector.shape_cast %1 : vector<1x8xf32> to vector<1x8x1xf32>
    %cst_2 = arith.constant 3.200000e+01 : f32
    %3 = vector.broadcast %cst_2 : f32 to vector<1x8x1xf32>
    %4 = arith.divf %2, %3 : vector<1x8x1xf32>
    %5 = vector.broadcast %4 : vector<1x8x1xf32> to vector<1x8x32xf32>
    %6 = arith.subf %0, %5 : vector<1x8x32xf32>
    %7 = arith.mulf %6, %6 : vector<1x8x32xf32>
    %cst_3 = arith.constant dense<0.000000e+00> : vector<1x8xf32>
    %8 = vector.multi_reduction <add>, %7, %cst_3 [2] : vector<1x8x32xf32> to vector<1x8xf32>
    %9 = vector.shape_cast %8 : vector<1x8xf32> to vector<1x8x1xf32>
    %cst_4 = arith.constant 3.200000e+01 : f32
    %10 = vector.broadcast %cst_4 : f32 to vector<1x8x1xf32>
    %11 = arith.divf %9, %10 : vector<1x8x1xf32>
    %cst_5 = arith.constant 9.99999974E-6 : f32
    %12 = vector.broadcast %cst_5 : f32 to vector<1x8x1xf32>
    %13 = arith.addf %11, %12 : vector<1x8x1xf32>
    %14 = math.rsqrt %13 : vector<1x8x1xf32>
    %15 = vector.broadcast %14 : vector<1x8x1xf32> to vector<1x8x32xf32>
    %16 = arith.mulf %6, %15 : vector<1x8x32xf32>
    %cst_6 = arith.constant dense<0.000000e+00> : vector<1x32xf32>
    %17 = vector.multi_reduction <add>, %16, %cst_6 [1] : vector<1x8x32xf32> to vector<1x32xf32>
    %18 = vector.shape_cast %17 : vector<1x32xf32> to vector<1x1x32xf32>
    %cst_7 = arith.constant 8.000000e+00 : f32
    %19 = vector.broadcast %cst_7 : f32 to vector<1x1x32xf32>
    %20 = arith.divf %18, %19 : vector<1x1x32xf32>
    %c0_8 = arith.constant 0 : index
    %c0_9 = arith.constant 0 : index
    %21 = vector.load %arg2[%c0_8, %c0_9] : memref<1x32xf32, #tpu.memory_space<vmem>>, vector<1x32xf32>
    %22 = vector.broadcast %20 : vector<1x1x32xf32> to vector<1x8x32xf32>
    %23 = arith.subf %16, %22 : vector<1x8x32xf32>
    %24 = vector.shape_cast %21 : vector<1x32xf32> to vector<1x1x32xf32>
    %25 = vector.broadcast %24 : vector<1x1x32xf32> to vector<1x8x32xf32>
    %26 = arith.mulf %23, %25 : vector<1x8x32xf32>
    %c0_10 = arith.constant 0 : index
    %c0_11 = arith.constant 0 : index
    %c0_12 = arith.constant 0 : index
    %27 = vector.load %arg3[%c0_10, %c0_11, %c0_12] : memref<1x8x32xf32, #tpu.memory_space<vmem>>, vector<1x8x32xf32>
    tpu.vector_store %arg3[%c0_10, %c0_11, %c0_12], %26 {strides = array<i32>} : memref<1x8x32xf32, #tpu.memory_space<vmem>>, vector<1x8x32xf32>,
    return
  }
  func.func @transform_0(%arg0: i32) -> (i32, i32, i32) {
    %c0_i32 = arith.constant 0 : i32
    %c0_i32_0 = arith.constant 0 : i32
    %c0_i32_1 = arith.constant 0 : i32
    return %arg0, %c0_i32, %c0_i32_0 : i32, i32, i32
  }
  func.func @transform_1(%arg0: i32) -> (i32, i32) {
    %c0_i32 = arith.constant 0 : i32
    %c0_i32_0 = arith.constant 0 : i32
    %c0_i32_1 = arith.constant 0 : i32
    return %c0_i32, %c0_i32_0 : i32, i32
  }
  func.func @transform_2(%arg0: i32) -> (i32, i32, i32) {
    %c0_i32 = arith.constant 0 : i32
    %c0_i32_0 = arith.constant 0 : i32
    %c0_i32_1 = arith.constant 0 : i32
    return %arg0, %c0_i32, %c0_i32_0 : i32, i32, i32
  }
}

</mosaic_0001>

<bundles_post_ra>
// kernel: tpu_custom_call.1
= control target key start
LH: loop header
LB: loop body
LE: loop exit
PB: predicated region body
PF: predicated region fallthrough
CT: control target
= control target key end

     0   :  { %7 = vsyncpa [#allocation3], 0  ;;  %s626_s0 = inlined_call_operand.hbm [shape: f32[2,8,32], index: 0, kind: input, shape index: {}]   ;;  %s627_s1 = inlined_call_operand.vmem [shape: f32[1,32], index: 1, kind: input, shape index: {}]   ;;  %s628_s2 = inlined_call_operand.hbm [shape: f32[2,8,32], index: 2, kind: output, shape index: {}]  }
   0x1   :  { %9 = vsyncpa [#allocation3 + $0x1], 0 }
   0x2   :  { %10 = vsyncpa [#allocation4], 0 }
   0x3   :  { %12 = vsyncpa [#allocation4 + $0x1], 0  ;;  %s454_s9 = smov 0   ;;  %s456_s10 = smov 0  }
   0x4   :  { %s458_s11 = smov 0   ;;  %s460_s12 = smov 0  }
   0x5 LB: > { %s475_s13 = sadd.s32 4294967295, %s435_s12   ;;  %s278_s14 = sadd.s32 4294967294, %s435_s12   ;;  %s435_s12 = sphi %s460_s12, %s643_s12   ;;  %s431_s11 = sphi %s458_s11, %s642_s11   ;;  %s427_s10 = sphi %s456_s10, %s641_s10   ;;  %s423_s9 = sphi %s454_s9, %s640_s9  }
   0x6   : > { %s479_s15 = sadd.s32 1, %s435_s12   ;;  %s25_s16 = sadd.s32 1, %s431_s11 }
   0x7   : > { %s22_s17 = ssub.s32 %s435_s12, %s479_s15  ;;  %p32_p0 = scmp.ne.s32.totalorder %s431_s11, %s427_s10 }
   0x8   : > { %p23_p1 = scmp.eq.s32.totalorder %s22_s17, 0  ;;  %p33_p2 = scmp.eq.s32.totalorder %s435_s12, 0 }
   0x9   : > { %p38_p3 = scmp.ne.s32.totalorder %s427_s10, %s423_s9  ;;  %p39_p4 = scmp.eq.s32.totalorder %s475_s13, 0 }
   0xa   : > { %s491_s18 = scalar_select %p23_p1, %s431_s11, %s25_s16  }
   0xb   : > { %p493_p5 = por %p33_p2, %p32_p0  ;;  %p497_p6 = por %p39_p4, %p38_p3 }
   0xc   : > { %p83_p7 = scmp.eq.s32.totalorder %s475_s13, 1  ;;  %p89_p8 = scmp.eq.s32.totalorder %s278_s14, 1 }
   0xd   : > { %p303_p10 = scmp.lt.s32.totalorder %s435_s12, 2  ;;  %s112_s23 = sand.u32 1, %s431_s11  }
   0xe   : > { %p504_p11 = por %p83_p7, %p32_p0  ;;  %p508_p12 = por %p89_p8, %p38_p3 }
   0xf   : > { %s282_s24 = sshll.u32 %s435_s12, 7  ;;  %s281_s25 = sshll.u32 %s112_s23, 3 }
  0x10   : > { %s632_s21 = scalar_select %p504_p11, 1, 0 }
  0x11   : > { %s633_s22 = scalar_select %p508_p12, 1, 0 }
  0x12   : > { %s517_s28 = scalar_lea.hbm %s626_s0, %s282_s24  ;;  %s116_s29 = scalar_lea.vmem [#allocation2], %s281_s25 }
  0x13   : > { %s123_s30 = sshll.u32 %s116_s29, 4  ;;  %p521_p13 = pnand %p303_p10, %p493_p5  ;;  %s525_s30 = int_to_ptr.vmem [resolvable:$true] %s123_s30 }
  0x14   : > { %s113_s4 = scalar_lea.sflag [#allocation3], %s112_s23  ;;  %s339_s5 = scalar_lea.hbm %s517_s28, 128 }
  0x15   : > { %p340_p2 = scmp.ne.s32.totalorder %s517_s28, %s339_s5  ;;  %p341_p3 = pneg %p521_p13 }
  0x16   : > { %s344_s8 = scalar_lea.hbm %s626_s0, 256  ;;  %p345_p5 = scmp.lt.u32.totalorder %s517_s28, %s626_s0 }
  0x17   : > { %p342_p4 = pnand %p341_p3, %p340_p2  ;;  %p346_p8 = scmp.lt.u32.totalorder %s344_s8, %s339_s5 }
  0x18   : > { %p348_p9 = scmp.lt.u32.totalorder %s339_s5, %s517_s28 }
  0x19   : > { %p343_p7 = pneg %p342_p4  ;;  %p347_p10 = por %p346_p8, %p345_p5 }
  0x1b   : > { %p349_p0 = por %p348_p9, %p347_p10 }
  0x1d   : > { %p350_p1 = pnand %p349_p0, %p343_p7 }
  0x1f   : > { %353 = shalt.err (!%p350_p1)
}
  0x20   : > { %s354_s17 = scalar_lea.vmem %s525_s30, 128  ;;  %s437_s19 = smov [#allocation2]  }
  0x21   : > { %p355_p2 = scmp.ne.s32.totalorder %s525_s30, %s354_s17  ;;  %s359_s23 = sshll.u32 %s437_s19, 4  ;;  %s360_s23 = int_to_ptr.vmem [resolvable:$false] %s359_s23 }
  0x22   : > { %s361_s24 = scalar_lea.vmem %s360_s23, 256  ;;  %p362_p11 = scmp.lt.s32.totalorder %s525_s30, %s360_s23 }
  0x23   : > { %p357_p4 = pnand %p355_p2, %p341_p3  ;;  %p363_p5 = scmp.lt.s32.totalorder %s361_s24, %s354_s17 }
  0x25   : > { %p358_p12 = pneg %p357_p4  ;;  %p364_p8 = por %p363_p5, %p362_p11 }
  0x27   : > { %p365_p9 = pnand %p364_p8, %p358_p12 }
  0x29   : > { %368 = shalt.err (!%p365_p9)
}
  0x2a   : > { %298 = dma.hbm_to_vmem [thread:$0]  (!%p521_p13), %s517_s28, 128, %s525_s30, %s113_s4  }
  0x2b   : > { %p635_p0 = scmp.lt.s32.totalorder %s435_s12, 3  ;;  %p636_p1 = scmp.ge.s32.totalorder %s435_s12, 1 }
  0x2d   : > { %p129_p3 = pnand %p636_p1, %p635_p0 }
  0x2e   : > { %s559_s25 = sand.u32 (!%p129_p3), 1, %s427_s10  }
  0x2f   : > { %132 = sbr.rel (%p129_p3) target bundleno = 398 (0x18e), region = 28  ;;  %s284_s26 = sshll.u32 (!%p129_p3), %s559_s25, 3 }
  0x30   : > { %s135_s27 = scalar_lea.sflag (!%p129_p3), [#allocation3], %s559_s25  ;;  %s138_s29 = scalar_lea.vmem (!%p129_p3), [#allocation2], %s284_s26 }
  0x36   : > { %414 = dma.done.wait (%p497_p6), %s135_s27, 128  }
  0x37   : > { %416 = vsyncadd (%p497_p6), %s135_s27, 4294967168  ;;  %vm160_vm0 = vcmask 261120   ;;  %v159_v0 = vld [vmem:[%s138_s29] sm:$0xff]  ;;  %s288_s30 = sshll.u32 %s475_s13, 7  ;;  %s158_s3 = scalar_lea.vmem [#allocation5], %s284_s26 }
  0x38   : > { %v161_v1 = vsel %vm160_vm0, %v159_v0, 0.0  ;;  %v286_v20 = vld [vmem:[%s627_s1] ss:$0 sm:$0xff]  ;;  %s208_s4 = sshll.u32 %s158_s3, 4  ;;  %s581_s7 = scalar_lea.hbm %s628_s2, %s288_s30  ;;  %s583_s4 = int_to_ptr.vmem [resolvable:$true] %s208_s4 }
  0x39   : > { %162 = vadd.xlane.f32.xlu0 %v161_v1  ;;  %s195_s8 = scalar_lea.sflag [#allocation4], %s559_s25  ;;  %s369_s14 = scalar_lea.vmem %s583_s4, 128 }
  0x3a   : > { %p370_p6 = scmp.ne.s32.totalorder %s583_s4, %s369_s14  ;;  %p637_p11 = scmp.ne.s32.totalorder %s632_s21, 0 }
  0x3b   : > { %s438_s13 = smov [#allocation5]  }
  0x3c   : > { %p371_p12 = pnand %p370_p6, %p637_p11  ;;  %s373_s16 = sshll.u32 %s438_s13, 4  ;;  %s374_s16 = int_to_ptr.vmem [resolvable:$false] %s373_s16 }
  0x3d   : > { %s375_s17 = scalar_lea.vmem %s374_s16, 256  ;;  %p376_p7 = scmp.lt.s32.totalorder %s583_s4, %s374_s16 }
  0x3e   : > { %p372_p13 = pneg %p371_p12  ;;  %p377_p10 = scmp.lt.s32.totalorder %s375_s17, %s369_s14 }
  0x40   : > { %p378_p2 = por %p377_p10, %p376_p7 }
  0x42   : > { %p379_p4 = pnand %p378_p2, %p372_p13 }
  0xc6   : > { %v163_v2 = vpop.xlane.xlu0 %162 }
  0xc7   : > { %v165_v3 = vmul.f32 0.03125, %v163_v2 }
  0xc9   : > { %v166_v4 = vsub.f32 %v159_v0, %v165_v3 }
  0xcb   : > { %v167_v5 = vmul.f32 %v166_v4, %v166_v4 }
  0xcd   : > { %v168_v6 = vsel %vm160_vm0, %v167_v5, 0.0 }
  0xce   : > { %169 = vadd.xlane.f32.xlu0 %v168_v6 }
 0x15b   : > { %v170_v7 = vpop.xlane.xlu0 %169 }
 0x15c   : > { %v171_v8 = vmul.f32 0.03125, %v170_v7 }
 0x15e   : > { %v172_v9 = vadd.f32 1e-05, %v171_v8 }
 0x160   : > { %337 = vrsqrt.f32 %v172_v9 }
 0x16a   : > { %v338_v10 = vpop.eup %337 }
 0x16b   : > { %v174_v11 = vmul.f32 %v338_v10, %v166_v4 }
 0x16d   : > { %v175_v12 = vsel %vm160_vm0, %v174_v11, 0.0 }
 0x16e   : > { %v176_v13 = vrot.slane %v175_v12, 4 }
 0x170   : > { %v177_v14 = vadd.f32 %v176_v13, %v175_v12 }
 0x172   : > { %v178_v15 = vrot.slane %v177_v14, 2 }
 0x174   : > { %v179_v16 = vadd.f32 %v178_v15, %v177_v14 }
 0x176   : > { %v180_v17 = vrot.slane %v179_v16, 1 }
 0x178   : > { %v181_v18 = vadd.f32 %v180_v17, %v179_v16 }
 0x17a   : > { %v183_v19 = vmul.f32 0.125, %v181_v18 }
 0x17c   : > { %v185_v21 = vsub.f32 %v174_v11, %v183_v19 }
 0x17e   : > { %v192_v22 = vmul.f32 %v286_v20, %v185_v21 }
 0x180   : > { %193 = vst.msk [vmem:[%s158_s3] sm:$0xff] %vm160_vm0, %v192_v22 }
 0x181   : > { %382 = shalt.err (!%p379_p4)
}
 0x182   : > { %s383_s19 = scalar_lea.hbm %s581_s7, 128  ;;  %s387_s25 = scalar_lea.hbm %s628_s2, 256 }
 0x183   : > { %p384_p5 = scmp.ne.s32.totalorder %s581_s7, %s383_s19  ;;  %p388_p0 = scmp.lt.u32.totalorder %s581_s7, %s628_s2 }
 0x184   : > { %p389_p1 = scmp.lt.u32.totalorder %s387_s25, %s383_s19  ;;  %p391_p6 = scmp.lt.u32.totalorder %s383_s19, %s581_s7 }
 0x185   : > { %p385_p8 = pnand %p384_p5, %p637_p11 }
 0x186   : > { %p390_p3 = por %p389_p1, %p388_p0 }
 0x187   : > { %p386_p9 = pneg %p385_p8 }
 0x188   : > { %p392_p12 = por %p391_p6, %p390_p3 }
 0x18a   : > { %p393_p13 = pnand %p392_p12, %p386_p9 }
 0x18c   : > { %396 = shalt.err (!%p393_p13)
}
 0x18d   : > { %293 = dma.vmem_to_hbm [thread:$0]  (%p637_p11), %s583_s4, 128, %s581_s7, %s195_s8  }
 0x18e PF: > { %s220_s29 = sand.u32 1, %s423_s9   ;;  %p638_p7 = scmp.ne.s32.totalorder %s633_s22, 0 }
 0x18f   : > { %p639_p10 = scmp.ge.s32.totalorder %s435_s12, 2  ;;  %s221_s20 = scalar_lea.sflag [#allocation4], %s220_s29 }
 0x191   : > { %p300_p2 = pnand %p639_p10, %p638_p7 }
 0x193   : > { %418 = dma.done.wait (!%p300_p2), %s221_s20, 128  }
 0x194   : > { %420 = vsyncadd (!%p300_p2), %s221_s20, 4294967168  ;;  %p15_p4 = scmp.ge.s32.totalorder %s479_s15, 4   ;;  %s640_s9 = smov %s427_s10 }
 0x195   : > { %s641_s10 = smov %s431_s11  ;;  %s642_s11 = smov %s491_s18 }
 0x196   : > { %s643_s12 = smov %s479_s15  ;;  %17 = sbr.rel (!%p15_p4) target bundleno = 5 (0x5), region = 73 }
 0x19d   :  { %226 = vsyncpa [#allocation3], 1 }
 0x19e   :  { %228 = vsyncpa [#allocation3 + $0x1], 1 }
 0x19f   :  { %229 = vsyncpa [#allocation4], 1 }
 0x1a0   :  { %231 = vsyncpa [#allocation4 + $0x1], 1 }

</bundles_post_ra>
